<compile_context>
chip_gen: v7x
topology: tpu7x:2x2x1
jax: 0.10.0
libtpu: 0.0.40
codegen_flags: <defaults>
</compile_context>

<pallas_src>
import jax
import jax.numpy as jnp
from jax.experimental import pallas as pl
from jax.experimental.pallas import tpu as pltpu


# ---------------------------------------------------------------------------
# Pallas kernel: fused 3x3x3 conv (single big matmul) + folded BN affine + ReLU
# ---------------------------------------------------------------------------
def _conv_bn_relu_kernel(x_ref, w_ref, scale_ref, shift_ref, o_ref):
    # x_ref:     (1, K, TILE_M) bf16   -- transposed im2col slab (K = 27*Cin)
    # w_ref:     (Cout, K)      bf16   -- packed conv weights
    # scale_ref: (Cout, 1)      f32    -- folded BN scale (gamma / sqrt(var+eps))
    # shift_ref: (Cout, 1)      f32    -- folded BN shift ((bias-mean)*scale + beta)
    # o_ref:     (1, Cout, TILE_M) f32
    y = jnp.dot(w_ref[...], x_ref[0], preferred_element_type=jnp.float32)
    y = y * scale_ref[...] + shift_ref[...]
    o_ref[0] = jnp.maximum(y, 0.0)


def _im2col_transposed(x):
    """x: (N, C, D, H, W) f32 -> (N, 27*C, D*H*W) tap matrix (transposed im2col)."""
    n, c, d, h, w = x.shape
    xp = jnp.pad(x, ((0, 0), (0, 0), (1, 1), (1, 1), (1, 1)))
    taps = []
    for kd in range(3):
        for kh in range(3):
            for kw in range(3):
                taps.append(
                    xp[:, :, kd:kd + d, kh:kh + h, kw:kw + w].reshape(n, c, d * h * w))
    return jnp.stack(taps, axis=1).reshape(n, 27 * c, d * h * w)


def conv3d_bn_relu(x, w, scale, shift, *, tile_m=512):
    """x: (N, Cin, D, H, W) f32; w: (3,3,3,Cin,Cout); scale/shift: (Cout,). NCDHW out."""
    n, cin, d, h, wd = x.shape
    cout = w.shape[-1]
    m = d * h * wd
    k = 27 * cin

    # Lane-dense M tiling (multiple of 128), pad M if needed.
    if m < tile_m:
        tile_m = ((m + 127) // 128) * 128
    m_pad = ((m + tile_m - 1) // tile_m) * tile_m

    # Glue: transposed im2col (K rows, M cols) + packed weights, both bf16.
    x_t = _im2col_transposed(x).astype(jnp.bfloat16)          # (N, K, M)
    if m_pad != m:
        x_t = jnp.pad(x_t, ((0, 0), (0, 0), (0, m_pad - m)))
    w_packed = jnp.transpose(w, (4, 0, 1, 2, 3)).reshape(cout, k).astype(jnp.bfloat16)

    out = pl.pallas_call(
        _conv_bn_relu_kernel,
        out_shape=jax.ShapeDtypeStruct((n, cout, m_pad), jnp.float32),
        grid=(n, m_pad // tile_m),
        in_specs=[
            pl.BlockSpec((1, k, tile_m), lambda b, t: (b, 0, t)),
            pl.BlockSpec((cout, k), lambda b, t: (0, 0)),
            pl.BlockSpec((cout, 1), lambda b, t: (0, 0)),
            pl.BlockSpec((cout, 1), lambda b, t: (0, 0)),
        ],
        out_specs=pl.BlockSpec((1, cout, tile_m), lambda b, t: (b, 0, t)),
        compiler_params=pltpu.CompilerParams(
            dimension_semantics=("parallel", "parallel"),
            vmem_limit_bytes=32 * 1024 * 1024),
    )(x_t, w_packed,
      scale.reshape(cout, 1).astype(jnp.float32),
      shift.reshape(cout, 1).astype(jnp.float32))

    return out[:, :, :m].reshape(n, cout, d, h, wd)


# ---------------------------------------------------------------------------
# Glue: trilinear upsample (align_corners=True) via dense interp matrices (MXU)
# ---------------------------------------------------------------------------
def _interp_matrix(s):
    """(2s, s) linear-interpolation matrix, scale=2, align_corners=True."""
    out = 2 * s
    if s == 1:
        return jnp.ones((out, s), jnp.float32)
    src = jnp.arange(out, dtype=jnp.float32) * (s - 1) / (out - 1)
    lo = jnp.floor(src)
    hi = jnp.minimum(lo + 1.0, float(s - 1))
    frac = src - lo
    cols = jnp.arange(s, dtype=jnp.float32)[None, :]
    a = (cols == lo[:, None]).astype(jnp.float32) * (1.0 - frac)[:, None] \
        + (cols == hi[:, None]).astype(jnp.float32) * frac[:, None]
    return a


def upsample_trilinear_2x(x):
    """x: NCDHW -> trilinear, scale_factor=2, align_corners=True (separable)."""
    _, _, d, h, w = x.shape
    ad, ah, aw = _interp_matrix(d), _interp_matrix(h), _interp_matrix(w)
    x = jnp.einsum('od,ncdhw->ncohw', ad, x)
    x = jnp.einsum('ph,ncdhw->ncdpw', ah, x)
    x = jnp.einsum('qw,ncdhw->ncdhq', aw, x)
    return x


def _fold_bn(bias, gamma, beta, mean, var, eps=1e-5):
    scale = gamma / jnp.sqrt(var + eps)
    shift = (bias - mean) * scale + beta
    return scale, shift


def init_up_params(key, in_channels, out_channels1, out_channels2):
    ks = jax.random.split(key, 8)
    p = {}
    p["w1"] = 0.1 * jax.random.normal(
        ks[0], (3, 3, 3, in_channels, out_channels1), jnp.float32)
    p["b1"] = 0.05 * jax.random.normal(ks[1], (out_channels1,), jnp.float32)
    p["gamma1"] = 1.0 + 0.1 * jax.random.normal(ks[2], (out_channels1,), jnp.float32)
    p["beta1"] = 0.1 * jax.random.normal(ks[3], (out_channels1,), jnp.float32)
    p["mean1"] = 0.05 * jax.random.normal(ks[2], (out_channels1,), jnp.float32)
    p["var1"] = 1.0 + 0.1 * jnp.abs(jax.random.normal(ks[3], (out_channels1,), jnp.float32))
    p["w2"] = 0.1 * jax.random.normal(
        ks[4], (3, 3, 3, out_channels1, out_channels2), jnp.float32)
    p["b2"] = 0.05 * jax.random.normal(ks[5], (out_channels2,), jnp.float32)
    p["gamma2"] = 1.0 + 0.1 * jax.random.normal(ks[6], (out_channels2,), jnp.float32)
    p["beta2"] = 0.1 * jax.random.normal(ks[7], (out_channels2,), jnp.float32)
    p["mean2"] = 0.05 * jax.random.normal(ks[6], (out_channels2,), jnp.float32)
    p["var2"] = 1.0 + 0.1 * jnp.abs(jax.random.normal(ks[7], (out_channels2,), jnp.float32))
    return p


def up_forward(x1, x2, params):
    """Forward of `Up` (trilinear=True). x1, x2: NCDHW float32."""
    # 1) trilinear 2x upsample of x1 (dense interp matrices -> MXU, no gathers)
    x1 = upsample_trilinear_2x(x1)

    # 2) pad x1 to x2's spatial size. This replicates the original PyTorch code
    #    *exactly as written* (diffY from dim 2 applied to dim 3, diffX from dim 3
    #    applied to dim 4, diffZ from dim 4 applied to dim 2) to preserve the
    #    module's forward semantics; all diffs are 0 for matched 2x shapes.
    diff_y = x2.shape[2] - x1.shape[2]
    diff_x = x2.shape[3] - x1.shape[3]
    diff_z = x2.shape[4] - x1.shape[4]
    x1 = jnp.pad(x1, (
        (0, 0), (0, 0),
        (diff_z // 2, diff_z - diff_z // 2),   # dim 2
        (diff_y // 2, diff_y - diff_y // 2),   # dim 3
        (diff_x // 2, diff_x - diff_x // 2),   # dim 4 (last)
    ))

    # 3) concat along channels (NCDHW)
    x = jnp.concatenate([x2, x1], axis=1)

    # 4) DoubleConv, hot path in the Pallas kernel (everything stays NCDHW).
    # TODO(synk): BatchNorm3d is applied in eval mode (folded running stats);
    # training-mode batch statistics are not implemented.
    s1, t1 = _fold_bn(params["b1"], params["gamma1"], params["beta1"],
                      params["mean1"], params["var1"])
    x = conv3d_bn_relu(x, params["w1"], s1, t1)
    s2, t2 = _fold_bn(params["b2"], params["gamma2"], params["beta2"],
                      params["mean2"], params["var2"])
    x = conv3d_bn_relu(x, params["w2"], s2, t2)
    return x


# ---------------------------------------------------------------------------
if __name__ == "__main__":
    key = jax.random.PRNGKey(0)
    k1, k2, kp = jax.random.split(key, 3)

    # Up(in_channels=8, out_channels1=8, out_channels2=4, trilinear=True)
    in_channels, out_channels1, out_channels2 = 8, 8, 4

    # x1: low-res skip (N, C, D, H, W); x2: high-res skip (2x spatial of x1)
    x1 = jax.random.normal(k1, (2, 4, 4, 8, 8), jnp.float32)
    x2 = jax.random.normal(k2, (2, 4, 8, 16, 16), jnp.float32)

    params = init_up_params(kp, in_channels, out_channels1, out_channels2)

    out = up_forward(x1, x2, params)
    out = jax.block_until_ready(out)

    assert out.shape == (2, out_channels2, 8, 16, 16), out.shape
    assert out.dtype == jnp.float32
    assert bool(jnp.all(jnp.isfinite(out)))
    assert bool(jnp.all(out >= 0.0))  # ReLU output
    print("KERNEL_OK")
</pallas_src>

<mosaic_0001>
module attributes {stable_mosaic.version = 11 : i64} {
  func.func @_conv_bn_relu_kernel(%arg0: i32, %arg1: i32, %arg2: memref<1x216x512xbf16, #tpu.memory_space<vmem>>, %arg3: memref<8x216xbf16, #tpu.memory_space<vmem>>, %arg4: memref<8x1xf32, #tpu.memory_space<vmem>>, %arg5: memref<8x1xf32, #tpu.memory_space<vmem>>, %arg6: memref<1x8x512xf32, #tpu.memory_space<vmem>>) attributes {dimension_semantics = [#tpu.dimension_semantics<parallel>, #tpu.dimension_semantics<parallel>], iteration_bounds = array<i64: 2, 4>, scalar_prefetch = 0 : i64, scratch_operands = 0 : i64, tpu.core_type = #tpu.core_type<tc>, window_params = [{transform_indices = @transform_0, window_bounds = array<i64: 1, 216, 512>}, {pipeline_mode = #tpu.pipeline_mode<synchronous>, transform_indices = @transform_1, window_bounds = array<i64: 8, 216>}, {pipeline_mode = #tpu.pipeline_mode<synchronous>, transform_indices = @transform_2, window_bounds = array<i64: 8, 1>}, {pipeline_mode = #tpu.pipeline_mode<synchronous>, transform_indices = @transform_3, window_bounds = array<i64: 8, 1>}, {transform_indices = @transform_4, window_bounds = array<i64: 1, 8, 512>}]} {
    %c0 = arith.constant 0 : index
    %c0_0 = arith.constant 0 : index
    %0 = vector.load %arg3[%c0, %c0_0] : memref<8x216xbf16, #tpu.memory_space<vmem>>, vector<8x216xbf16>
    %c0_1 = arith.constant 0 : index
    %c0_2 = arith.constant 0 : index
    %c0_3 = arith.constant 0 : index
    %1 = vector.load %arg2[%c0_1, %c0_2, %c0_3] : memref<1x216x512xbf16, #tpu.memory_space<vmem>>, vector<1x216x512xbf16>
    %2 = vector.shape_cast %1 : vector<1x216x512xbf16> to vector<216x512xbf16>
    %cst = arith.constant dense<0.000000e+00> : vector<8x512xf32>
    %3 = tpu.matmul %0, %2, %cst {dimension_numbers = #tpu.dot_dimension_numbers<[1], [0], [0], [1], [0, 0, 1, 1], [], []>} : vector<8x216xbf16>, vector<216x512xbf16>, vector<8x512xf32> -> vector<8x512xf32>
    %c0_4 = arith.constant 0 : index
    %c0_5 = arith.constant 0 : index
    %4 = vector.load %arg4[%c0_4, %c0_5] : memref<8x1xf32, #tpu.memory_space<vmem>>, vector<8x1xf32>
    %5 = vector.broadcast %4 : vector<8x1xf32> to vector<8x512xf32>
    %6 = arith.mulf %3, %5 : vector<8x512xf32>
    %c0_6 = arith.constant 0 : index
    %c0_7 = arith.constant 0 : index
    %7 = vector.load %arg5[%c0_6, %c0_7] : memref<8x1xf32, #tpu.memory_space<vmem>>, vector<8x1xf32>
    %8 = vector.broadcast %7 : vector<8x1xf32> to vector<8x512xf32>
    %9 = arith.addf %6, %8 : vector<8x512xf32>
    %cst_8 = arith.constant 0.000000e+00 : f32
    %10 = vector.broadcast %cst_8 : f32 to vector<8x512xf32>
    %11 = arith.maximumf %9, %10 : vector<8x512xf32>
    %c0_9 = arith.constant 0 : index
    %c0_10 = arith.constant 0 : index
    %c0_11 = arith.constant 0 : index
    %12 = vector.load %arg6[%c0_9, %c0_10, %c0_11] : memref<1x8x512xf32, #tpu.memory_space<vmem>>, vector<1x8x512xf32>
    %13 = vector.shape_cast %12 : vector<1x8x512xf32> to vector<8x512xf32>
    %14 = vector.shape_cast %11 : vector<8x512xf32> to vector<1x8x512xf32>
    tpu.vector_store %arg6[%c0_9, %c0_10, %c0_11], %14 {strides = array<i32>} : memref<1x8x512xf32, #tpu.memory_space<vmem>>, vector<1x8x512xf32>,
    return
  }
  func.func @transform_0(%arg0: i32, %arg1: i32) -> (i32, i32, i32) {
    %c0_i32 = arith.constant 0 : i32
    %c0_i32_0 = arith.constant 0 : i32
    return %arg0, %c0_i32, %arg1 : i32, i32, i32
  }
  func.func @transform_1(%arg0: i32, %arg1: i32) -> (i32, i32) {
    %c0_i32 = arith.constant 0 : i32
    %c0_i32_0 = arith.constant 0 : i32
    %c0_i32_1 = arith.constant 0 : i32
    return %c0_i32, %c0_i32_0 : i32, i32
  }
  func.func @transform_2(%arg0: i32, %arg1: i32) -> (i32, i32) {
    %c0_i32 = arith.constant 0 : i32
    %c0_i32_0 = arith.constant 0 : i32
    %c0_i32_1 = arith.constant 0 : i32
    return %c0_i32, %c0_i32_0 : i32, i32
  }
  func.func @transform_3(%arg0: i32, %arg1: i32) -> (i32, i32) {
    %c0_i32 = arith.constant 0 : i32
    %c0_i32_0 = arith.constant 0 : i32
    %c0_i32_1 = arith.constant 0 : i32
    return %c0_i32, %c0_i32_0 : i32, i32
  }
  func.func @transform_4(%arg0: i32, %arg1: i32) -> (i32, i32, i32) {
    %c0_i32 = arith.constant 0 : i32
    %c0_i32_0 = arith.constant 0 : i32
    return %arg0, %c0_i32, %arg1 : i32, i32, i32
  }
}

</mosaic_0001>

<bundles_post_ra>
// kernel: tpu_custom_call.1
= control target key start
LH: loop header
LB: loop body
LE: loop exit
PB: predicated region body
PF: predicated region fallthrough
CT: control target
= control target key end

     0   :  { %s1573_s0 = inlined_call_operand.hbm [shape: bf16[2,216,2048], index: 0, kind: input, shape index: {}]   ;;  %s1574_s1 = inlined_call_operand.hbm [shape: bf16[8,216], index: 1, kind: input, shape index: {}]   ;;  %s1575_s2 = inlined_call_operand.vmem [shape: f32[8,1], index: 2, kind: input, shape index: {}]   ;;  %s1576_s3 = inlined_call_operand.vmem [shape: f32[8,1], index: 3, kind: input, shape index: {}]   ;;  %s1577_s4 = inlined_call_operand.hbm [shape: f32[2,8,2048], index: 4, kind: output, shape index: {}]  }
   0x1   :  { %1590 = sst [smem:[#allocation16_spill]] %s1574_s1 }
   0x2   :  { %9 = vsyncpa [#allocation3], 0 }
   0x3   :  { %11 = vsyncpa [#allocation3 + $0x1], 0 }
   0x4   :  { %12 = vsyncpa [#allocation6], 0 }
   0x5   :  { %13 = vsyncpa [#allocation4], 0 }
   0x6   :  { %15 = vsyncpa [#allocation4 + $0x1], 0  ;;  %s1275_s15 = smov 0   ;;  %s1277_s16 = smov 0  }
   0x7   :  { %s1279_s17 = smov 0   ;;  %s1281_s18 = smov 0  }
   0x8   :  { %s1283_s19 = smov 0   ;;  %s1285_s20 = smov 0  }
   0x9   :  { %s1287_s21 = smov 0   ;;  %s1289_s22 = smov 0  }
   0xa LB: > { %1591 = sst [smem:[#allocation11_spill]] %s1213_s15  ;;  %s822_s23 = sadd.s32 4294967295, %s1241_s22   ;;  %s1241_s22 = sphi %s1289_s22, %s1622_s22   ;;  %s1237_s21 = sphi %s1287_s21, %s1621_s21   ;;  %s1233_s20 = sphi %s1285_s20, %s1616_s20   ;;  %s1229_s19 = sphi %s1283_s19, %s1620_s19   ;;  %s1225_s18 = sphi %s1281_s18, %s1615_s18   ;;  %s1221_s17 = sphi %s1279_s17, %s1619_s17   ;;  %s1217_s16 = sphi %s1277_s16, %s1618_s16   ;;  %s1213_s15 = sphi %s1275_s15, %s1617_s15  }
   0xb   : > { %1592 = sst [smem:[#allocation12_spill]] %s1233_s20  ;;  %s823_s24 = sadd.s32 4294967294, %s1241_s22  }
   0xc   : > { %1593 = sst [smem:[#allocation13_spill]] %s1241_s22  ;;  %p49_p0 = scmp.ne.s32.totalorder %s1221_s17, %s1217_s16 }
   0xd   : > { %p50_p1 = scmp.eq.s32.totalorder %s1241_s22, 0  ;;  %p55_p2 = scmp.ne.s32.totalorder %s1217_s16, %s1213_s15 }
   0xe   : > { %p1323_p3 = scmp.eq.s32.totalorder %s822_s23, 0  ;;  %p144_p4 = scmp.eq.s32.totalorder %s822_s23, 7 }
   0xf   : > { %p1327_p5 = por %p50_p1, %p49_p0  ;;  %p150_p6 = scmp.eq.s32.totalorder %s823_s24, 7 }
  0x10   : > { %s1594_s26 = scalar_select %p1323_p3, 1, 0 }
  0x11   : > { %p1333_p7 = por %p1323_p3, %p55_p2  ;;  %p1337_p8 = por %p144_p4, %p49_p0 }
  0x12   : > { %p1341_p9 = por %p150_p6, %p55_p2  ;;  %p824_p10 = scmp.ge.s32.totalorder %s1241_s22, 1 }
  0x13   : > { %s1596_s28 = scalar_select %p1333_p7, 1, 0 }
  0x14   : > { %s1597_s29 = scalar_select %p1337_p8, 1, 0 }
  0x15   : > { %s1598_s30 = scalar_select %p1341_p9, 1, 0 }
  0x16   : > { %p157_p11 = scmp.lt.s32.totalorder %s1241_s22, 9  ;;  %s1243_s6 = smov [#allocation5]  }
  0x17   : > { %1599 = sst [smem:[#allocation14_spill]] %s1598_s30  ;;  %s170_s7 = sshll.u32 %s1243_s6, 4  ;;  %s171_s7 = int_to_ptr.vmem [resolvable:$true] %s170_s7 }
  0x18   : > { %p1347_p12 = pnand %p824_p10, %p157_p11  ;;  %p924_p13 = scmp.lt.s32.totalorder %s1241_s22, 8 }
  0x19   : > { %s30_s10 = sadd.s32 1, %s1233_s20  ;;  %s1603_s1 = sld [smem:[#allocation16_spill]] }
  0x1a   : > { %s1600_s5 = scalar_select %p1347_p12, 1, 0 }
  0x1b   : > { %p911_p0 = pneg %p1347_p12  ;;  %p1356_p1 = pnand %p924_p13, %p1327_p5 }
  0x1d   : > { %s1601_s8 = scalar_select %p1356_p1, 1, 0 }
  0x1e   : > { %p1362_p2 = pnand %p911_p0, %p1323_p3 }
  0x1f   : > { %s1081_s13 = scalar_lea.hbm %s1603_s1, 128 }
  0x20   : > { %p1082_p4 = scmp.ne.s32.totalorder %s1603_s1, %s1081_s13  ;;  %p1083_p5 = pneg %p1362_p2 }
  0x21   : > { %p1088_p11 = scmp.lt.u32.totalorder %s1081_s13, %s1603_s1 }
  0x22   : > { %p1084_p6 = pnand %p1083_p5, %p1082_p4 }
  0x24   : > { %p1085_p10 = pneg %p1084_p6 }
  0x26   : > { %p1090_p13 = pnand %p1088_p11, %p1085_p10 }
  0x28   : > { %1093 = shalt.err (!%p1090_p13)
}
  0x29   : > { %s1094_s6 = scalar_lea.vmem %s171_s7, 128  ;;  %p1102_p3 = scmp.lt.s32.totalorder %s171_s7, %s171_s7 }
  0x2a   : > { %p1095_p0 = scmp.ne.s32.totalorder %s171_s7, %s1094_s6  ;;  %p1103_p7 = scmp.lt.s32.totalorder %s1094_s6, %s1094_s6 }
  0x2c   : > { %p1097_p9 = pnand %p1095_p0, %p1083_p5  ;;  %p1104_p12 = por %p1103_p7, %p1102_p3 }
  0x2e   : > { %p1098_p8 = pneg %p1097_p9 }
  0x30   : > { %p1105_p1 = pnand %p1104_p12, %p1098_p8 }
  0x32   : > { %1108 = shalt.err (!%p1105_p1)
}
  0x33   : > { %914 = dma.hbm_to_vmem [thread:$0]  (!%p1362_p2), %s1603_s1, 128, %s171_s7, [#allocation6]  }
  0x34   : > { %p31_p4 = scmp.ge.s32.totalorder %s30_s10, 4  ;;  %s33_s13 = sadd.s32 1, %s1237_s21 }
  0x35   : > { %s187_s14 = sand.u32 1, %s1221_s17   ;;  %s827_s23 = sshll.u32 %s1233_s20, 2 }
  0x36   : > { %s1624_s10 = smov (%p31_p4, %s30_s10), 0  ;;  %s1626_s13 = smov (!%p31_p4, %s33_s13), %s1237_s21 }
  0x37   : > { %1604 = sst [smem:[#allocation15_spill]] %s1624_s10  ;;  %s38_s9 = ssub.s32 %s1233_s20, %s1624_s10 }
  0x38   : > { %p35_p3 = scmp.ge.s32.totalorder %s1626_s13, 2  ;;  %s900_s24 = smul.u32 432, %s187_s14 }
  0x39   : > { %s901_s27 = smul.u32 432, %s1237_s21  ;;  %s1605_s15 = sadd.s32 1, %s1221_s17 }
  0x3a   : > { %s1628_s13 = smov (%p35_p3, %s1626_s13), 0  ;;  %s191_s10 = scalar_lea.vmem [#allocation2], %s900_s24 }
  0x3b   : > { %s197_s7 = sadd.s32 %s901_s27, %s827_s23  ;;  %s37_s6 = ssub.s32 %s1237_s21, %s1628_s13 }
  0x3c   : > { %s828_s11 = sshll.u32 %s197_s7, 6  ;;  %s39_s12 = sor.u32 %s38_s9, %s37_s6 }
  0x3d   : > { %s1399_s30 = scalar_lea.hbm %s1573_s0, %s828_s11  ;;  %p40_p7 = scmp.eq.s32.totalorder %s39_s12, 0 }
  0x3e   : > { %s200_s20 = sshll.u32 %s191_s10, 4  ;;  %s1408_s23 = scalar_lea.sflag [#allocation3], %s187_s14  ;;  %s1401_s20 = int_to_ptr.vmem [resolvable:$true] %s200_s20 }
  0x3f   : > { %s1406_s22 = scalar_select %p40_p7, %s1221_s17, %s1605_s15  }
  0x40   : > { %s1109_s9 = scalar_lea.hbm %s1399_s30, 6912  ;;  %p1606_p9 = scmp.ne.s32.totalorder %s1601_s8, 0 }
  0x41   : > { %p1110_p8 = scmp.ne.s32.totalorder %s1399_s30, %s1109_s9  ;;  %s1114_s24 = scalar_lea.hbm %s1573_s0, 55296 }
  0x42   : > { %p1111_p12 = pneg %p1606_p9  ;;  %p1115_p5 = scmp.lt.u32.totalorder %s1399_s30, %s1573_s0 }
  0x43   : > { %p1116_p6 = scmp.lt.u32.totalorder %s1114_s24, %s1109_s9  ;;  %p1118_p11 = scmp.lt.u32.totalorder %s1109_s9, %s1399_s30 }
  0x44   : > { %p1112_p1 = pnand %p1111_p12, %p1110_p8 }
  0x45   : > { %p1117_p10 = por %p1116_p6, %p1115_p5 }
  0x46   : > { %p1113_p2 = pneg %p1112_p1 }
  0x47   : > { %p1119_p13 = por %p1118_p11, %p1117_p10 }
  0x49   : > { %p1120_p0 = pnand %p1119_p13, %p1113_p2 }
  0x4b   : > { %1123 = shalt.err (!%p1120_p0)
}
  0x4c   : > { %s1124_s15 = scalar_lea.vmem %s1401_s20, 6912  ;;  %s1244_s14 = smov [#allocation2]  }
  0x4d   : > { %p1125_p4 = scmp.ne.s32.totalorder %s1401_s20, %s1124_s15  ;;  %s1129_s7 = sshll.u32 %s1244_s14, 4  ;;  %s1130_s7 = int_to_ptr.vmem [resolvable:$false] %s1129_s7 }
  0x4e   : > { %s1131_s6 = scalar_lea.vmem %s1130_s7, 13824  ;;  %p1132_p8 = scmp.lt.s32.totalorder %s1401_s20, %s1130_s7 }
  0x4f   : > { %p1127_p3 = pnand %p1125_p4, %p1111_p12  ;;  %p1133_p1 = scmp.lt.s32.totalorder %s1131_s6, %s1124_s15 }
  0x51   : > { %p1128_p7 = pneg %p1127_p3  ;;  %p1134_p5 = por %p1133_p1, %p1132_p8 }
  0x53   : > { %p1135_p6 = pnand %p1134_p5, %p1128_p7 }
  0x55   : > { %1138 = shalt.err (!%p1135_p6)
}
  0x56   : > { %s1245_s11 = smov 1024   ;;  %s1246_s12 = smov 256  }
  0x57   : > { %s1247_s9 = smov 16   ;;  %p1607_p12 = scmp.ne.s32.totalorder %s1600_s5, 0 }
  0x58   : > { %918 = dma.hbm_to_vmem [thread:$0]  (!%p1606_p9), %s1399_s30, 6912, %s1401_s20, %s1408_s23, %s1245_s11, %s1246_s12, %s1247_s9  }
  0x59   : > { %212 = sbr.rel (%p1607_p12) target bundleno = 391 (0x187), region = 36  ;;  %s1439_s1 = sand.u32 (!%p1607_p12), 1, %s1217_s16  }
  0x5a   : > { %s902_s25 = smul.u32 (!%p1607_p12), 432, %s1439_s1  ;;  %s215_s24 = scalar_lea.sflag (!%p1607_p12), [#allocation3], %s1439_s1 }
  0x5b   : > { %p1608_p2 = scmp.ne.s32.totalorder (!%p1607_p12), %s1596_s28, 0 }
  0x5c   : > { %s1443_s10 = scalar_lea.vmem (!%p1607_p12), [#allocation2], %s902_s25 }
  0x60   : > { %1200 = dma.done.wait (%p1608_p2), %s215_s24, 6912  }
  0x61   : > { %1202 = vsyncadd (%p1608_p2), %s215_s24, 4294960384  ;;  %p1609_p9 = scmp.ne.s32.totalorder %s1594_s26, 0 }
  0x63   : > { %1204 = dma.done.wait (%p1609_p9), [#allocation6], 128  }
  0x64   : > { %1206 = vsyncadd (%p1609_p9), [#allocation6], 4294967168  ;;  %v1248_v0 = vmov 0   ;;  %v997_v1 = vld [vmem:[%s1443_s10 + $0x4] ss:$16 sps:$4 sm:$0xff]   ;;  %vm581_vm0 = vcmask 719872  }
  0x65   : > { %996 = vset.pattern.permute.xlu0 %v1248_v0  ;;  %v999_v2 = vld [vmem:[%s1443_s10 + $0xc] ss:$16 sps:$4 sm:$0xff]   ;;  %598 = vmatprep.subr.bf16.mxu0 %v997_v1  ;;  %v1001_v3 = vld [vmem:[%s1443_s10] ss:$16 sps:$4 sm:$0xff]   ;;  %v1002_v4 = vld [vmem:[%s1443_s10 + $0x8] ss:$16 sps:$4 sm:$0xff]  }
  0x66   : > { %639 = vmatprep.subr.bf16.mxu1 %v999_v2  ;;  %v1003_v5 = vld [vmem:[%s1443_s10 + $0x24] ss:$16 sps:$4 sm:$0xff]   ;;  %599 = vmatpush1.bf16.msra.mxu0 %v1001_v3  ;;  %v1005_v6 = vld [vmem:[%s1443_s10 + $0x2c] ss:$16 sps:$4 sm:$0xff]   ;;  %v1007_v7 = vld [vmem:[%s1443_s10 + $0x20] ss:$16 sps:$4 sm:$0xff]  }
  0x67   : > { %640 = vmatpush1.bf16.msra.mxu1 %v1002_v4  ;;  %600 = vmatprep.subr.bf16.mxu0 %v1003_v5  ;;  %v1008_v8 = vld [vmem:[%s1443_s10 + $0x28] ss:$16 sps:$4 sm:$0xff]   ;;  %v1009_v9 = vld [vmem:[%s1443_s10 + $0x44] ss:$16 sps:$4 sm:$0xff]   ;;  %v1011_v10 = vld [vmem:[%s1443_s10 + $0x4c] ss:$16 sps:$4 sm:$0xff]  }
  0x68   : > { %641 = vmatprep.subr.bf16.mxu1 %v1005_v6  ;;  %v1013_v11 = vld [vmem:[%s1443_s10 + $0x40] ss:$16 sps:$4 sm:$0xff]   ;;  %v1014_v12 = vld [vmem:[%s1443_s10 + $0x48] ss:$16 sps:$4 sm:$0xff]   ;;  %v1015_v13 = vld [vmem:[%s1443_s10 + $0x64] ss:$16 sps:$4 sm:$0xff]  }
  0x69   : > { %v1017_v14 = vld [vmem:[%s1443_s10 + $0x6c] ss:$16 sps:$4 sm:$0xff]   ;;  %v1019_v15 = vld [vmem:[%s1443_s10 + $0x60] ss:$16 sps:$4 sm:$0xff]   ;;  %v1020_v16 = vld [vmem:[%s1443_s10 + $0x68] ss:$16 sps:$4 sm:$0xff]  }
  0x6a   : > { %601 = vmatpush1.bf16.msra.mxu0 %v1007_v7  ;;  %v1021_v17 = vld [vmem:[%s1443_s10 + $0x84] ss:$16 sps:$4 sm:$0xff]   ;;  %v1023_v18 = vld [vmem:[%s1443_s10 + $0x8c] ss:$16 sps:$4 sm:$0xff]   ;;  %v1025_v19 = vld [vmem:[%s1443_s10 + $0x80] ss:$16 sps:$4 sm:$0xff]  }
  0x6b   : > { %642 = vmatpush1.bf16.msra.mxu1 %v1008_v8  ;;  %602 = vmatprep.subr.bf16.mxu0 %v1009_v9  ;;  %v1026_v20 = vld [vmem:[%s1443_s10 + $0x88] ss:$16 sps:$4 sm:$0xff]   ;;  %v1027_v21 = vld [vmem:[%s1443_s10 + $0xa4] ss:$16 sps:$4 sm:$0xff]   ;;  %v1029_v22 = vld [vmem:[%s1443_s10 + $0xac] ss:$16 sps:$4 sm:$0xff]  }
  0x6c   : > { %643 = vmatprep.subr.bf16.mxu1 %v1011_v10  ;;  %v1031_v23 = vld [vmem:[%s1443_s10 + $0xa0] ss:$16 sps:$4 sm:$0xff]   ;;  %v1032_v24 = vld [vmem:[%s1443_s10 + $0xa8] ss:$16 sps:$4 sm:$0xff]   ;;  %v1033_v25 = vld [vmem:[%s1443_s10 + $0xc4] ss:$16 sps:$4 sm:$0xff]  }
  0x6d   : > { %v1035_v26 = vld [vmem:[%s1443_s10 + $0xcc] ss:$16 sps:$4 sm:$0xff]   ;;  %v1037_v27 = vld [vmem:[%s1443_s10 + $0xc0] ss:$16 sps:$4 sm:$0xff]   ;;  %v1038_v28 = vld [vmem:[%s1443_s10 + $0xc8] ss:$16 sps:$4 sm:$0xff]  }
  0x6e   : > { %603 = vmatpush1.bf16.msra.mxu0 %v1013_v11  ;;  %v1039_v29 = vld [vmem:[%s1443_s10 + $0xe4] ss:$16 sps:$4 sm:$0xff]   ;;  %v1041_v30 = vld [vmem:[%s1443_s10 + $0xec] ss:$16 sps:$4 sm:$0xff]   ;;  %v1043_v31 = vld [vmem:[%s1443_s10 + $0xe0] ss:$16 sps:$4 sm:$0xff]  }
  0x6f   : > { %644 = vmatpush1.bf16.msra.mxu1 %v1014_v12  ;;  %604 = vmatprep.subr.bf16.mxu0 %v1015_v13  ;;  %v1044_v32 = vld [vmem:[%s1443_s10 + $0xe8] ss:$16 sps:$4 sm:$0xff]   ;;  %v1045_v33 = vld [vmem:[%s1443_s10 + $0x104] ss:$16 sps:$4 sm:$0xff]   ;;  %v1047_v34 = vld [vmem:[%s1443_s10 + $0x10c] ss:$16 sps:$4 sm:$0xff]  }
  0x70   : > { %645 = vmatprep.subr.bf16.mxu1 %v1017_v14  ;;  %v1049_v35 = vld [vmem:[%s1443_s10 + $0x100] ss:$16 sps:$4 sm:$0xff]   ;;  %v1050_v36 = vld [vmem:[%s1443_s10 + $0x108] ss:$16 sps:$4 sm:$0xff]   ;;  %v1051_v37 = vld [vmem:[%s1443_s10 + $0x124] ss:$16 sps:$4 sm:$0xff]  }
  0x71   : > { %v1053_v38 = vld [vmem:[%s1443_s10 + $0x12c] ss:$16 sps:$4 sm:$0xff]   ;;  %v250_v39 = vld [vmem:[#allocation5] sm:$0xff]  ;;  %v1056_v42 = vld [vmem:[%s1443_s10 + $0x128] ss:$16 sps:$4 sm:$0xff]   ;;  %vm585_vm1 = vcmask 1043456  }
  0x72   : > { %605 = vmatpush1.bf16.msra.mxu0 %v1019_v15  ;;  %v680_v40 = vld [vmem:[%s1575_s2] sm:$0xff]  ;;  %v1059_v44 = vld [vmem:[%s1443_s10 + $0x14c] ss:$16 sps:$4 sm:$0xff]   ;;  %v833_v45 = vcombine.high %v250_v39, %v250_v39  ;;  %v1062_v48 = vld [vmem:[%s1443_s10 + $0x148] ss:$16 sps:$4 sm:$0xff]   ;;  %v832_v1 = vcombine.low %v250_v39, %v250_v39  ;;  %s831_s5 = sshll.u32 %s1439_s1, 5 }
  0x73   : > { %646 = vmatpush1.bf16.msra.mxu1 %v1020_v16  ;;  %606 = vmatprep.subr.bf16.mxu0 %v1021_v17  ;;  %v1055_v41 = vld [vmem:[%s1443_s10 + $0x120] ss:$16 sps:$4 sm:$0xff]   ;;  %v1057_v43 = vld [vmem:[%s1443_s10 + $0x144] ss:$16 sps:$4 sm:$0xff]   ;;  %v1065_v50 = vld [vmem:[%s1443_s10 + $0x16c] ss:$16 sps:$4 sm:$0xff]  }
  0x74   : > { %647 = vmatprep.subr.bf16.mxu1 %v1023_v18  ;;  %683 = vperm.xlu0 %996, %v680_v40   ;;  %v690_v46 = vld [vmem:[%s1576_s3] sm:$0xff]  ;;  %v1068_v52 = vld [vmem:[%s1443_s10 + $0x168] ss:$16 sps:$4 sm:$0xff]   ;;  %v1071_v54 = vld [vmem:[%s1443_s10 + $0x18c] ss:$16 sps:$4 sm:$0xff]   ;;  %s895_s8 = sshll.u32 %s1225_s18, 2 }
  0x75   : > { %891 = vmatprep.mubr.msk.bf16.mxu0 %vm581_vm0, %v833_v45  ;;  %893 = vmatprep.mubr.msk.bf16.mxu1 %vm581_vm0, %v833_v45  ;;  %v1061_v47 = vld [vmem:[%s1443_s10 + $0x140] ss:$16 sps:$4 sm:$0xff]   ;;  %v1063_v49 = vld [vmem:[%s1443_s10 + $0x164] ss:$16 sps:$4 sm:$0xff]   ;;  %v304_v56 = vld [vmem:[%s1443_s10 + $0x1a8] sm:$0xff]  ;;  %s896_s23 = sshll.u32 %s1229_s19, 4 }
  0x76   : > { %607 = vmatpush1.bf16.msra.mxu0 %v1025_v19  ;;  %v1067_v51 = vld [vmem:[%s1443_s10 + $0x160] ss:$16 sps:$4 sm:$0xff]   ;;  %v1069_v53 = vld [vmem:[%s1443_s10 + $0x184] ss:$16 sps:$4 sm:$0xff]   ;;  %v1074_v58 = vld [vmem:[%s1443_s10 + $0x188] ss:$16 sps:$4 sm:$0xff]   ;;  %v889_v60 = vcombine.high %v304_v56, %v304_v56  ;;  %v888_v62 = vcombine.low %v304_v56, %v304_v56  ;;  %s721_s27 = sadd.s32 %s896_s23, %s895_s8 }
  0x77   : > { %648 = vmatpush1.bf16.msra.mxu1 %v1026_v20  ;;  %608 = vmatprep.subr.bf16.mxu0 %v1027_v21  ;;  %v303_v55 = vld [vmem:[%s1443_s10 + $0x1a0] sm:$0xff]  ;;  %s897_s15 = sshll.u32 %s721_s27, 7  ;;  %s246_s18 = scalar_lea.vmem [#allocation7], %s831_s5 }
  0x78   : > { %649 = vmatprep.subr.bf16.mxu1 %v1029_v22  ;;  %693 = vperm.xlu0 %996, %v690_v46   ;;  %v1073_v57 = vld [vmem:[%s1443_s10 + $0x180] ss:$16 sps:$4 sm:$0xff]   ;;  %v887_v59 = vcombine.high %v303_v55, %v303_v55  ;;  %v886_v61 = vcombine.low %v303_v55, %v303_v55  ;;  %v593_v0 = vsel %vm585_vm1, %v888_v62, 0  ;;  %s725_s19 = sshll.u32 %s246_s18, 4  ;;  %s1519_s6 = scalar_lea.hbm %s1577_s4, %s897_s15  ;;  %s1521_s19 = int_to_ptr.vmem [resolvable:$true] %s725_s19 }
  0x79   : > { %s709_s11 = scalar_lea.sflag [#allocation4], %s1439_s1  ;;  %s1139_s12 = scalar_lea.vmem %s1521_s19, 512 }
  0x7a   : > { %609 = vmatpush1.bf16.msra.mxu0 %v1031_v23  ;;  %v587_v63 = vsel %vm585_vm1, %v886_v61, 0  ;;  %p1140_p10 = scmp.ne.s32.totalorder %s1521_s19, %s1139_s12  ;;  %p1610_p11 = scmp.ne.s32.totalorder %s1597_s29, 0 }
  0x7b   : > { %650 = vmatpush1.bf16.msra.mxu1 %v1032_v24  ;;  %610 = vmatprep.subr.bf16.mxu0 %v1033_v25  ;;  %s1249_s9 = smov [#allocation7]  }
  0x7c   : > { %651 = vmatprep.subr.bf16.mxu1 %v1035_v26  ;;  %p1141_p13 = pnand %p1140_p10, %p1610_p11  ;;  %s1143_s25 = sshll.u32 %s1249_s9, 4  ;;  %s1144_s25 = int_to_ptr.vmem [resolvable:$false] %s1143_s25 }
  0x7d   : > { %s1145_s24 = scalar_lea.vmem %s1144_s25, 1024  ;;  %p1146_p4 = scmp.lt.s32.totalorder %s1521_s19, %s1144_s25 }
  0x7e   : > { %611 = vmatpush1.bf16.msra.mxu0 %v1037_v27  ;;  %p1142_p0 = pneg %p1141_p13  ;;  %p1147_p3 = scmp.lt.s32.totalorder %s1145_s24, %s1139_s12 }
  0x7f   : > { %652 = vmatpush1.bf16.msra.mxu1 %v1038_v28  ;;  %612 = vmatprep.subr.bf16.mxu0 %v1039_v29 }
  0x80   : > { %653 = vmatprep.subr.bf16.mxu1 %v1041_v30  ;;  %p1148_p7 = por %p1147_p3, %p1146_p4 }
  0x82   : > { %613 = vmatpush1.bf16.msra.mxu0 %v1043_v31  ;;  %p1149_p8 = pnand %p1148_p7, %p1142_p0 }
  0x83   : > { %654 = vmatpush1.bf16.msra.mxu1 %v1044_v32  ;;  %614 = vmatprep.subr.bf16.mxu0 %v1045_v33 }
  0x84   : > { %655 = vmatprep.subr.bf16.mxu1 %v1047_v34 }
  0x86   : > { %615 = vmatpush1.bf16.msra.mxu0 %v1049_v35 }
  0x87   : > { %656 = vmatpush1.bf16.msra.mxu1 %v1050_v36  ;;  %616 = vmatprep.subr.bf16.mxu0 %v1051_v37 }
  0x88   : > { %657 = vmatprep.subr.bf16.mxu1 %v1053_v38 }
  0x8a   : > { %617 = vmatpush1.bf16.msra.mxu0 %v1055_v41 }
  0x8b   : > { %658 = vmatpush1.bf16.msra.mxu1 %v1056_v42  ;;  %618 = vmatprep.subr.bf16.mxu0 %v1057_v43 }
  0x8c   : > { %659 = vmatprep.subr.bf16.mxu1 %v1059_v44 }
  0x8e   : > { %619 = vmatpush1.bf16.msra.mxu0 %v1061_v47 }
  0x8f   : > { %660 = vmatpush1.bf16.msra.mxu1 %v1062_v48  ;;  %620 = vmatprep.subr.bf16.mxu0 %v1063_v49 }
  0x90   : > { %661 = vmatprep.subr.bf16.mxu1 %v1065_v50 }
  0x92   : > { %621 = vmatpush1.bf16.msra.mxu0 %v1067_v51 }
  0x93   : > { %662 = vmatpush1.bf16.msra.mxu1 %v1068_v52  ;;  %622 = vmatprep.subr.bf16.mxu0 %v1069_v53 }
  0x94   : > { %663 = vmatprep.subr.bf16.mxu1 %v1071_v54 }
  0x96   : > { %623 = vmatpush1.bf16.msra.mxu0 %v1073_v57 }
  0x97   : > { %664 = vmatpush1.bf16.msra.mxu1 %v1074_v58  ;;  %890 = vmatprep.subr.msk.bf16.mxu0 %vm585_vm1, %v887_v59 }
  0x98   : > { %892 = vmatprep.subr.msk.bf16.mxu1 %vm585_vm1, %v889_v60 }
  0x9a   : > { %625 = vmatpush1.bf16.msra.mxu0 %v587_v63 }
  0x9b   : > { %666 = vmatpush1.bf16.msra.mxu1 %v593_v0 }
  0x9d   : > { %631 = vmatmul.mubr.bf16.vlgmr.msra.gmra.mrb[0].mxu0 %v832_v1 }
  0x9e   : > { %672 = vmatmul.mubr.bf16.vlgmr.msra.gmra.mrb[0].mxu1 %v832_v1 }
  0xf3   : > { %v684_v2 = vpop.permute.xlu0 %683 }
  0xf7   : > { %v694_v3 = vpop.permute.xlu0 %693 }
 0x170   : > { %v632_v4 = vpop.f32.mrb[0].mxu0 }
 0x171   : > { %v673_v5 = vpop.f32.mrb[0].mxu1  ;;  %v686_v6 = vmul.f32 %v684_v2, %v632_v4  ;;  %v634_v8 = vpop.f32.mrb[1].mxu0 }
 0x172   : > { %v688_v7 = vmul.f32 %v684_v2, %v673_v5  ;;  %v675_v9 = vpop.f32.mrb[1].mxu1  ;;  %v687_v10 = vmul.f32 %v684_v2, %v634_v8  ;;  %v636_v12 = vpop.f32.mrb[2].mxu0 }
 0x173   : > { %v689_v11 = vmul.f32 %v684_v2, %v675_v9  ;;  %v677_v13 = vpop.f32.mrb[2].mxu1  ;;  %v696_v14 = vadd.f32 %v694_v3, %v686_v6  ;;  %v637_v16 = vpop.f32.mrb[3].mxu0 }
 0x174   : > { %v698_v15 = vadd.f32 %v694_v3, %v688_v7  ;;  %v678_v17 = vpop.f32.mrb[3].mxu1  ;;  %v697_v18 = vadd.f32 %v694_v3, %v687_v10 }
 0x175   : > { %v699_v19 = vadd.f32 %v694_v3, %v689_v11  ;;  %v700_v20 = vmax.f32 %v696_v14, 0.0 }
 0x176   : > { %v702_v21 = vmax.f32 %v698_v15, 0.0  ;;  %v701_v22 = vmax.f32 %v697_v18, 0.0 }
 0x177   : > { %v703_v23 = vmax.f32 %v699_v19, 0.0  ;;  %704 = vst [vmem:[%s246_s18] sm:$0xff] %v700_v20 }
 0x178   : > { %706 = vst [vmem:[%s246_s18 + $0x10] sm:$0xff] %v702_v21  ;;  %705 = vst [vmem:[%s246_s18 + $0x8] sm:$0xff] %v701_v22 }
 0x179   : > { %707 = vst [vmem:[%s246_s18 + $0x18] sm:$0xff] %v703_v23 }
 0x17a   : > { %1152 = shalt.err (!%p1149_p8)
}
 0x17b   : > { %s1153_s1 = scalar_lea.hbm %s1519_s6, 512  ;;  %s1157_s26 = scalar_lea.hbm %s1577_s4, 4096 }
 0x17c   : > { %p1154_p1 = scmp.ne.s32.totalorder %s1519_s6, %s1153_s1  ;;  %p1158_p12 = scmp.lt.u32.totalorder %s1519_s6, %s1577_s4 }
 0x17d   : > { %p1159_p2 = scmp.lt.u32.totalorder %s1157_s26, %s1153_s1  ;;  %p1161_p10 = scmp.lt.u32.totalorder %s1153_s1, %s1519_s6 }
 0x17e   : > { %p1155_p5 = pnand %p1154_p1, %p1610_p11 }
 0x17f   : > { %p1160_p9 = por %p1159_p2, %p1158_p12 }
 0x180   : > { %p1156_p6 = pneg %p1155_p5 }
 0x181   : > { %p1162_p13 = por %p1161_p10, %p1160_p9 }
 0x183   : > { %p1163_p0 = pnand %p1162_p13, %p1156_p6 }
 0x185   : > { %1166 = shalt.err (!%p1163_p0)
}
 0x186   : > { %909 = dma.vmem_to_hbm [thread:$0]  (%p1610_p11), %s1521_s19, 512, %s1519_s6, %s709_s11  }
 0x187 PF: > { %s1611_s5 = sld [smem:[#allocation13_spill]]  ;;  %s1612_s8 = sld [smem:[#allocation11_spill]] }
 0x188   : > { %s1613_s23 = sld [smem:[#allocation14_spill]] }
 0x18d   : > { %p926_p4 = scmp.ge.s32.totalorder %s1611_s5, 2  ;;  %s737_s27 = sand.u32 1, %s1612_s8  }
 0x18e   : > { %p1614_p3 = scmp.ne.s32.totalorder %s1613_s23, 0  ;;  %s738_s15 = scalar_lea.sflag [#allocation4], %s737_s27 }
 0x190   : > { %p920_p7 = pnand %p926_p4, %p1614_p3 }
 0x192   : > { %1208 = dma.done.wait (!%p920_p7), %s738_s15, 512  }
 0x193   : > { %1210 = vsyncadd (!%p920_p7), %s738_s15, 4294966784  ;;  %s21_s14 = sadd.s32 1, %s1611_s5   ;;  %s1615_s18 = sld [smem:[#allocation12_spill]] }
 0x194   : > { %p18_p8 = scmp.ge.s32.totalorder %s21_s14, 10   ;;  %s1616_s20 = sld [smem:[#allocation15_spill]] }
 0x195   : > { %s1617_s15 = smov %s1217_s16  ;;  %s1618_s16 = smov %s1221_s17 }
 0x196   : > { %s1619_s17 = smov %s1406_s22  ;;  %s1620_s19 = smov %s1237_s21 }
 0x197   : > { %s1621_s21 = smov %s1628_s13  ;;  %s1622_s22 = smov %s21_s14 }
 0x198   :  { %20 = sbr.rel (!%p18_p8) target bundleno = 10 (0xa), region = 85 }
 0x19f   :  { %743 = vsyncpa [#allocation3], 1 }
 0x1a0   :  { %745 = vsyncpa [#allocation3 + $0x1], 1 }
 0x1a1   :  { %746 = vsyncpa [#allocation6], 1 }
 0x1a2   :  { %747 = vsyncpa [#allocation4], 1 }
 0x1a3   :  { %749 = vsyncpa [#allocation4 + $0x1], 1 }

</bundles_post_ra>
